<compile_context>
chip_gen: v7x
topology: tpu7x:2x2x1
jax: 0.10.0
libtpu: 0.0.40
codegen_flags: <defaults>
</compile_context>

<pallas_src>
import jax
import jax.numpy as jnp
from jax.experimental import pallas as pl
from jax.experimental.pallas import tpu as pltpu

HIDDEN = 50          # true hidden width of the torch module
HIDDEN_PAD = 64      # sublane-aligned hidden width used inside the kernel
OUT = 3              # true output width
OUT_PAD = 128        # lane-aligned width used for the final matmul only


def _make_kernel(use_bf16):
    def fnn_kernel(x_ref,
                   w1_ref, b1_ref,
                   w2_ref, b2_ref,
                   w3_ref, b3_ref,
                   w4_ref, b4_ref,
                   w5_ref, b5_ref,
                   o_ref):
        x = x_ref[...]                                   # (TM, 2) f32
        # Layer 1: K=2 -> pure VPU broadcast multiply-add (skip the MXU).
        h = jnp.tanh(x[:, 0:1] * w1_ref[0:1, :]
                     + x[:, 1:2] * w1_ref[1:2, :]
                     + b1_ref[...])                      # (TM, 64) f32
        if use_bf16:
            h = h.astype(jnp.bfloat16)

        def hidden(h, w_ref, b_ref):
            # MXU matmul, f32 accumulation; activation carried in bf16 when
            # use_bf16 (bf16-capable VPU/EUP on v6e/v7x).
            acc = jnp.dot(h, w_ref[...], preferred_element_type=jnp.float32)
            if use_bf16:
                acc = acc.astype(jnp.bfloat16)
            return jnp.tanh(acc + b_ref[...])

        h = hidden(h, w2_ref, b2_ref)                    # (TM, 64)
        h = hidden(h, w3_ref, b3_ref)
        h = hidden(h, w4_ref, b4_ref)

        # Layer 5: matmul into the 128-lane padded space (clean MXU tile),
        # but store only the 3 real columns -> 12 B/row output DMA.
        out = jnp.dot(h, w5_ref[...],
                      preferred_element_type=jnp.float32) + b5_ref[...]
        o_ref[...] = out[:, :OUT].astype(o_ref.dtype)    # (TM, 3)

    return fnn_kernel


def _pad(a, shape):
    return jnp.pad(a, [(0, s - d) for d, s in zip(a.shape, shape)])


def pad_params(params, use_bf16):
    """Zero-pad (in,out) weights / (1,out) biases to aligned kernel shapes.

    Padded hidden columns stay exactly 0 through every layer (zero weight
    columns + zero bias -> tanh(0) = 0) and padded output columns are never
    stored, so results match the unpadded math.

    In bf16 mode, W2..W5 and the hidden biases are pre-cast to bf16 here so
    the kernel does no per-grid-step casts; w1/b1/b5 stay f32."""
    (w1, b1), (w2, b2), (w3, b3), (w4, b4), (w5, b5) = params
    mm = jnp.bfloat16 if use_bf16 else jnp.float32
    return (
        _pad(w1, (2, HIDDEN_PAD)),                     _pad(b1, (1, HIDDEN_PAD)),
        _pad(w2, (HIDDEN_PAD, HIDDEN_PAD)).astype(mm), _pad(b2, (1, HIDDEN_PAD)).astype(mm),
        _pad(w3, (HIDDEN_PAD, HIDDEN_PAD)).astype(mm), _pad(b3, (1, HIDDEN_PAD)).astype(mm),
        _pad(w4, (HIDDEN_PAD, HIDDEN_PAD)).astype(mm), _pad(b4, (1, HIDDEN_PAD)).astype(mm),
        _pad(w5, (HIDDEN_PAD, OUT_PAD)).astype(mm),    _pad(b5, (1, OUT_PAD)),
    )


def _default_use_bf16():
    """bf16 matmul/activation path on bf16-native chips (v6e/v7x); f32 on
    older generations (v5e has no bf16 VPU/EUP arithmetic)."""
    try:
        kind = jax.devices()[0].device_kind.lower()
    except Exception:
        return False
    return not any(v in kind for v in ("v2", "v3", "v4", "v5"))


def fnn_forward(x, params, *, tile_m=4096, use_bf16=None):
    """x: arbitrary shape with total size divisible by 2 (torch x.view(-1, 2)).

    tile_m: rows per grid step.  Weights (~100 KB) are resident, so only the
    x (2 cols) and output (3 cols) tiles scale with tile_m; 4096 rows amortize
    the ~0.35us per-step pipeline overhead while staying far under VMEM.
    For mid/large batches the tile is capped at ~n/2 so the grid has >= 2
    'parallel' steps (keeps both v7x TensorCores busy).
    use_bf16: None -> auto by chip; False -> exact f32 reference math.
    """
    if use_bf16 is None:
        use_bf16 = _default_use_bf16()

    x2 = x.reshape(-1, 2).astype(jnp.float32)
    n = x2.shape[0]

    # Tile choice.
    if n <= 1024:
        tm = max(8, pl.cdiv(n, 8) * 8)                      # single grid step
    else:
        half = pl.cdiv(n, 2)
        tm = min(tile_m, max(256, pl.cdiv(half, 256) * 256))  # >= 2 grid steps
    n_pad = pl.cdiv(n, tm) * tm
    if n_pad != n:
        x2 = jnp.pad(x2, ((0, n_pad - n), (0, 0)))

    padded = pad_params(params, use_bf16)

    def full_spec(arr):
        # Constant index_map -> block stays resident in VMEM across the grid.
        return pl.BlockSpec(arr.shape, lambda i: (0, 0))

    # VMEM budget: x and output tiles are lane-padded to 128 words/row in
    # VMEM and double-buffered; weights are small.  Stay under v7x's 64 MiB.
    io_bytes = 2 * 2 * tm * 128 * 4
    vmem_limit = min(max(32 * 1024 * 1024, int(io_bytes * 1.5) + (2 << 20)),
                     60 * 1024 * 1024)

    grid = (n_pad // tm,)
    out = pl.pallas_call(
        _make_kernel(use_bf16),
        out_shape=jax.ShapeDtypeStruct((n_pad, OUT), jnp.float32),
        grid_spec=pltpu.PrefetchScalarGridSpec(
            num_scalar_prefetch=0,
            grid=grid,
            in_specs=[pl.BlockSpec((tm, 2), lambda i: (i, 0))]   # x tile
                     + [full_spec(p) for p in padded],
            out_specs=pl.BlockSpec((tm, OUT), lambda i: (i, 0)),  # narrow output
        ),
        compiler_params=pltpu.CompilerParams(
            dimension_semantics=("parallel",),
            vmem_limit_bytes=vmem_limit),
    )(x2, *padded)
    return out[:n]


def init_params(key):
    """Deterministic synthetic init matching the torch module's shapes.
    Weights stored as (in_features, out_features), biases as (1, out_features)."""
    dims = [(2, HIDDEN), (HIDDEN, HIDDEN), (HIDDEN, HIDDEN),
            (HIDDEN, HIDDEN), (HIDDEN, OUT)]
    params = []
    for (fan_in, fan_out) in dims:
        key, kw, kb = jax.random.split(key, 3)
        bound = 1.0 / jnp.sqrt(fan_in)
        w = jax.random.uniform(kw, (fan_in, fan_out), jnp.float32, -bound, bound)
        b = jax.random.uniform(kb, (1, fan_out), jnp.float32, -bound, bound)
        params.append((w, b))
    return params


def fnn_reference(x, params):
    h = x.reshape(-1, 2).astype(jnp.float32)
    for i, (w, b) in enumerate(params):
        h = h @ w + b
        if i < len(params) - 1:
            h = jnp.tanh(h)
    return h


if __name__ == "__main__":
    key = jax.random.PRNGKey(0)
    kp, kx, kx2 = jax.random.split(key, 3)
    params = init_params(kp)

    # Small input consistent with forward's x.view(-1, 2): (8, 2, 2) -> (16, 2)
    x = jax.random.normal(kx, (8, 2, 2), jnp.float32)
    y = jax.block_until_ready(fnn_forward(x, params, use_bf16=False))
    y_ref = fnn_reference(x, params)
    assert y.shape == (16, 3)
    assert jnp.allclose(y, y_ref, atol=1e-5, rtol=1e-5)

    # Larger batch exercises the multi-grid-step (>=2 'parallel' steps) path
    # with batch padding and the narrow (N, 3) output.
    xb = jax.random.normal(kx2, (2500, 2), jnp.float32)
    yb = jax.block_until_ready(fnn_forward(xb, params, use_bf16=False))
    yb_ref = fnn_reference(xb, params)
    assert yb.shape == (2500, 3)
    assert jnp.allclose(yb, yb_ref, atol=1e-4, rtol=1e-4)

    # bf16 MXU/EUP path (the default on v6e/v7x): looser tolerance.
    yb_bf16 = jax.block_until_ready(fnn_forward(xb, params, use_bf16=True))
    assert yb_bf16.shape == (2500, 3)
    assert jnp.allclose(yb_bf16, yb_ref, atol=5e-2, rtol=5e-2)

    print("KERNEL_OK")
</pallas_src>

<mosaic_0001>
module attributes {stable_mosaic.version = 11 : i64} {
  func.func @fnn_kernel(%arg0: i32, %arg1: memref<16x2xf32, #tpu.memory_space<vmem>>, %arg2: memref<2x64xf32, #tpu.memory_space<vmem>>, %arg3: memref<1x64xf32, #tpu.memory_space<vmem>>, %arg4: memref<64x64xf32, #tpu.memory_space<vmem>>, %arg5: memref<1x64xf32, #tpu.memory_space<vmem>>, %arg6: memref<64x64xf32, #tpu.memory_space<vmem>>, %arg7: memref<1x64xf32, #tpu.memory_space<vmem>>, %arg8: memref<64x64xf32, #tpu.memory_space<vmem>>, %arg9: memref<1x64xf32, #tpu.memory_space<vmem>>, %arg10: memref<64x128xf32, #tpu.memory_space<vmem>>, %arg11: memref<1x128xf32, #tpu.memory_space<vmem>>, %arg12: memref<16x3xf32, #tpu.memory_space<vmem>>) attributes {dimension_semantics = [#tpu.dimension_semantics<parallel>], iteration_bounds = array<i64: 1>, scalar_prefetch = 0 : i64, scratch_operands = 0 : i64, tpu.core_type = #tpu.core_type<tc>, window_params = [{transform_indices = @transform_0, window_bounds = array<i64: 16, 2>}, {pipeline_mode = #tpu.pipeline_mode<synchronous>, transform_indices = @transform_1, window_bounds = array<i64: 2, 64>}, {pipeline_mode = #tpu.pipeline_mode<synchronous>, transform_indices = @transform_2, window_bounds = array<i64: 1, 64>}, {pipeline_mode = #tpu.pipeline_mode<synchronous>, transform_indices = @transform_3, window_bounds = array<i64: 64, 64>}, {pipeline_mode = #tpu.pipeline_mode<synchronous>, transform_indices = @transform_4, window_bounds = array<i64: 1, 64>}, {pipeline_mode = #tpu.pipeline_mode<synchronous>, transform_indices = @transform_5, window_bounds = array<i64: 64, 64>}, {pipeline_mode = #tpu.pipeline_mode<synchronous>, transform_indices = @transform_6, window_bounds = array<i64: 1, 64>}, {pipeline_mode = #tpu.pipeline_mode<synchronous>, transform_indices = @transform_7, window_bounds = array<i64: 64, 64>}, {pipeline_mode = #tpu.pipeline_mode<synchronous>, transform_indices = @transform_8, window_bounds = array<i64: 1, 64>}, {pipeline_mode = #tpu.pipeline_mode<synchronous>, transform_indices = @transform_9, window_bounds = array<i64: 64, 128>}, {pipeline_mode = #tpu.pipeline_mode<synchronous>, transform_indices = @transform_10, window_bounds = array<i64: 1, 128>}, {transform_indices = @transform_11, window_bounds = array<i64: 16, 3>}]} {
    %c0 = arith.constant 0 : index
    %c0_0 = arith.constant 0 : index
    %0 = vector.load %arg1[%c0, %c0_0] : memref<16x2xf32, #tpu.memory_space<vmem>>, vector<16x2xf32>
    %1 = vector.extract_strided_slice %0 {offsets = [0, 0], sizes = [16, 1], strides = [1, 1]} : vector<16x2xf32> to vector<16x1xf32>
    %c0_1 = arith.constant 0 : index
    %c0_2 = arith.constant 0 : index
    %2 = vector.load %arg2[%c0_1, %c0_2] : memref<2x64xf32, #tpu.memory_space<vmem>>, vector<1x64xf32>
    %3 = vector.broadcast %1 : vector<16x1xf32> to vector<16x64xf32>
    %4 = vector.broadcast %2 : vector<1x64xf32> to vector<16x64xf32>
    %5 = arith.mulf %3, %4 : vector<16x64xf32>
    %6 = vector.extract_strided_slice %0 {offsets = [0, 1], sizes = [16, 1], strides = [1, 1]} : vector<16x2xf32> to vector<16x1xf32>
    %c1 = arith.constant 1 : index
    %c0_3 = arith.constant 0 : index
    %7 = vector.load %arg2[%c1, %c0_3] : memref<2x64xf32, #tpu.memory_space<vmem>>, vector<1x64xf32>
    %8 = vector.broadcast %6 : vector<16x1xf32> to vector<16x64xf32>
    %9 = vector.broadcast %7 : vector<1x64xf32> to vector<16x64xf32>
    %10 = arith.mulf %8, %9 : vector<16x64xf32>
    %11 = arith.addf %5, %10 : vector<16x64xf32>
    %c0_4 = arith.constant 0 : index
    %c0_5 = arith.constant 0 : index
    %12 = vector.load %arg3[%c0_4, %c0_5] : memref<1x64xf32, #tpu.memory_space<vmem>>, vector<1x64xf32>
    %13 = vector.broadcast %12 : vector<1x64xf32> to vector<16x64xf32>
    %14 = arith.addf %11, %13 : vector<16x64xf32>
    %15 = math.tanh %14 : vector<16x64xf32>
    %c0_6 = arith.constant 0 : index
    %c0_7 = arith.constant 0 : index
    %16 = vector.load %arg4[%c0_6, %c0_7] : memref<64x64xf32, #tpu.memory_space<vmem>>, vector<64x64xf32>
    %cst = arith.constant dense<0.000000e+00> : vector<16x64xf32>
    %17 = tpu.matmul %15, %16, %cst {dimension_numbers = #tpu.dot_dimension_numbers<[1], [0], [0], [1], [0, 0, 1, 1], [], []>} : vector<16x64xf32>, vector<64x64xf32>, vector<16x64xf32> -> vector<16x64xf32>
    %c0_8 = arith.constant 0 : index
    %c0_9 = arith.constant 0 : index
    %18 = vector.load %arg5[%c0_8, %c0_9] : memref<1x64xf32, #tpu.memory_space<vmem>>, vector<1x64xf32>
    %19 = vector.broadcast %18 : vector<1x64xf32> to vector<16x64xf32>
    %20 = arith.addf %17, %19 : vector<16x64xf32>
    %21 = math.tanh %20 : vector<16x64xf32>
    %c0_10 = arith.constant 0 : index
    %c0_11 = arith.constant 0 : index
    %22 = vector.load %arg6[%c0_10, %c0_11] : memref<64x64xf32, #tpu.memory_space<vmem>>, vector<64x64xf32>
    %cst_12 = arith.constant dense<0.000000e+00> : vector<16x64xf32>
    %23 = tpu.matmul %21, %22, %cst_12 {dimension_numbers = #tpu.dot_dimension_numbers<[1], [0], [0], [1], [0, 0, 1, 1], [], []>} : vector<16x64xf32>, vector<64x64xf32>, vector<16x64xf32> -> vector<16x64xf32>
    %c0_13 = arith.constant 0 : index
    %c0_14 = arith.constant 0 : index
    %24 = vector.load %arg7[%c0_13, %c0_14] : memref<1x64xf32, #tpu.memory_space<vmem>>, vector<1x64xf32>
    %25 = vector.broadcast %24 : vector<1x64xf32> to vector<16x64xf32>
    %26 = arith.addf %23, %25 : vector<16x64xf32>
    %27 = math.tanh %26 : vector<16x64xf32>
    %c0_15 = arith.constant 0 : index
    %c0_16 = arith.constant 0 : index
    %28 = vector.load %arg8[%c0_15, %c0_16] : memref<64x64xf32, #tpu.memory_space<vmem>>, vector<64x64xf32>
    %cst_17 = arith.constant dense<0.000000e+00> : vector<16x64xf32>
    %29 = tpu.matmul %27, %28, %cst_17 {dimension_numbers = #tpu.dot_dimension_numbers<[1], [0], [0], [1], [0, 0, 1, 1], [], []>} : vector<16x64xf32>, vector<64x64xf32>, vector<16x64xf32> -> vector<16x64xf32>
    %c0_18 = arith.constant 0 : index
    %c0_19 = arith.constant 0 : index
    %30 = vector.load %arg9[%c0_18, %c0_19] : memref<1x64xf32, #tpu.memory_space<vmem>>, vector<1x64xf32>
    %31 = vector.broadcast %30 : vector<1x64xf32> to vector<16x64xf32>
    %32 = arith.addf %29, %31 : vector<16x64xf32>
    %33 = math.tanh %32 : vector<16x64xf32>
    %c0_20 = arith.constant 0 : index
    %c0_21 = arith.constant 0 : index
    %34 = vector.load %arg10[%c0_20, %c0_21] : memref<64x128xf32, #tpu.memory_space<vmem>>, vector<64x128xf32>
    %cst_22 = arith.constant dense<0.000000e+00> : vector<16x128xf32>
    %35 = tpu.matmul %33, %34, %cst_22 {dimension_numbers = #tpu.dot_dimension_numbers<[1], [0], [0], [1], [0, 0, 1, 1], [], []>} : vector<16x64xf32>, vector<64x128xf32>, vector<16x128xf32> -> vector<16x128xf32>
    %c0_23 = arith.constant 0 : index
    %c0_24 = arith.constant 0 : index
    %36 = vector.load %arg11[%c0_23, %c0_24] : memref<1x128xf32, #tpu.memory_space<vmem>>, vector<1x128xf32>
    %37 = vector.broadcast %36 : vector<1x128xf32> to vector<16x128xf32>
    %38 = arith.addf %35, %37 : vector<16x128xf32>
    %39 = vector.extract_strided_slice %38 {offsets = [0, 0], sizes = [16, 3], strides = [1, 1]} : vector<16x128xf32> to vector<16x3xf32>
    %c0_25 = arith.constant 0 : index
    %c0_26 = arith.constant 0 : index
    %40 = vector.load %arg12[%c0_25, %c0_26] : memref<16x3xf32, #tpu.memory_space<vmem>>, vector<16x3xf32>
    tpu.vector_store %arg12[%c0_25, %c0_26], %39 {strides = array<i32>} : memref<16x3xf32, #tpu.memory_space<vmem>>, vector<16x3xf32>,
    return
  }
  func.func @transform_0(%arg0: i32) -> (i32, i32) {
    %c0_i32 = arith.constant 0 : i32
    %c0_i32_0 = arith.constant 0 : i32
    return %arg0, %c0_i32 : i32, i32
  }
  func.func @transform_1(%arg0: i32) -> (i32, i32) {
    %c0_i32 = arith.constant 0 : i32
    %c0_i32_0 = arith.constant 0 : i32
    %c0_i32_1 = arith.constant 0 : i32
    return %c0_i32, %c0_i32_0 : i32, i32
  }
  func.func @transform_2(%arg0: i32) -> (i32, i32) {
    %c0_i32 = arith.constant 0 : i32
    %c0_i32_0 = arith.constant 0 : i32
    %c0_i32_1 = arith.constant 0 : i32
    return %c0_i32, %c0_i32_0 : i32, i32
  }
  func.func @transform_3(%arg0: i32) -> (i32, i32) {
    %c0_i32 = arith.constant 0 : i32
    %c0_i32_0 = arith.constant 0 : i32
    %c0_i32_1 = arith.constant 0 : i32
    return %c0_i32, %c0_i32_0 : i32, i32
  }
  func.func @transform_4(%arg0: i32) -> (i32, i32) {
    %c0_i32 = arith.constant 0 : i32
    %c0_i32_0 = arith.constant 0 : i32
    %c0_i32_1 = arith.constant 0 : i32
    return %c0_i32, %c0_i32_0 : i32, i32
  }
  func.func @transform_5(%arg0: i32) -> (i32, i32) {
    %c0_i32 = arith.constant 0 : i32
    %c0_i32_0 = arith.constant 0 : i32
    %c0_i32_1 = arith.constant 0 : i32
    return %c0_i32, %c0_i32_0 : i32, i32
  }
  func.func @transform_6(%arg0: i32) -> (i32, i32) {
    %c0_i32 = arith.constant 0 : i32
    %c0_i32_0 = arith.constant 0 : i32
    %c0_i32_1 = arith.constant 0 : i32
    return %c0_i32, %c0_i32_0 : i32, i32
  }
  func.func @transform_7(%arg0: i32) -> (i32, i32) {
    %c0_i32 = arith.constant 0 : i32
    %c0_i32_0 = arith.constant 0 : i32
    %c0_i32_1 = arith.constant 0 : i32
    return %c0_i32, %c0_i32_0 : i32, i32
  }
  func.func @transform_8(%arg0: i32) -> (i32, i32) {
    %c0_i32 = arith.constant 0 : i32
    %c0_i32_0 = arith.constant 0 : i32
    %c0_i32_1 = arith.constant 0 : i32
    return %c0_i32, %c0_i32_0 : i32, i32
  }
  func.func @transform_9(%arg0: i32) -> (i32, i32) {
    %c0_i32 = arith.constant 0 : i32
    %c0_i32_0 = arith.constant 0 : i32
    %c0_i32_1 = arith.constant 0 : i32
    return %c0_i32, %c0_i32_0 : i32, i32
  }
  func.func @transform_10(%arg0: i32) -> (i32, i32) {
    %c0_i32 = arith.constant 0 : i32
    %c0_i32_0 = arith.constant 0 : i32
    %c0_i32_1 = arith.constant 0 : i32
    return %c0_i32, %c0_i32_0 : i32, i32
  }
  func.func @transform_11(%arg0: i32) -> (i32, i32) {
    %c0_i32 = arith.constant 0 : i32
    %c0_i32_0 = arith.constant 0 : i32
    return %arg0, %c0_i32 : i32, i32
  }
}

</mosaic_0001>

<bundles_post_ra>
// kernel: tpu_custom_call.1
= control target key start
LH: loop header
LB: loop body
LE: loop exit
PB: predicated region body
PF: predicated region fallthrough
CT: control target
= control target key end

     0   :  { %16 = vsyncpa [#allocation3], 0  ;;  %s1041_s0 = inlined_call_operand.vmem [shape: f32[16,2], index: 0, kind: input, shape index: {}]   ;;  %s1042_s1 = inlined_call_operand.vmem [shape: f32[2,64], index: 1, kind: input, shape index: {}]   ;;  %s1043_s2 = inlined_call_operand.vmem [shape: f32[1,64], index: 2, kind: input, shape index: {}]   ;;  %s1044_s3 = inlined_call_operand.hbm [shape: f32[64,64], index: 3, kind: input, shape index: {}]   ;;  %s1045_s4 = inlined_call_operand.vmem [shape: f32[1,64], index: 4, kind: input, shape index: {}]   ;;  %s1046_s5 = inlined_call_operand.hbm [shape: f32[64,64], index: 5, kind: input, shape index: {}]   ;;  %s1047_s6 = inlined_call_operand.vmem [shape: f32[1,64], index: 6, kind: input, shape index: {}]   ;;  %s1048_s7 = inlined_call_operand.hbm [shape: f32[64,64], index: 7, kind: input, shape index: {}]   ;;  %s1049_s8 = inlined_call_operand.vmem [shape: f32[1,64], index: 8, kind: input, shape index: {}]   ;;  %s1050_s9 = inlined_call_operand.hbm [shape: f32[64,128], index: 9, kind: input, shape index: {}]   ;;  %s1051_s10 = inlined_call_operand.vmem [shape: f32[1,128], index: 10, kind: input, shape index: {}]   ;;  %s1052_s11 = inlined_call_operand.vmem [shape: f32[16,3], index: 11, kind: output, shape index: {}]  }
   0x1   :  { %17 = vsyncpa [#allocation5], 0 }
   0x2   :  { %18 = vsyncpa [#allocation8], 0  ;;  %s858_s17 = smov [#allocation4]   ;;  %s859_s19 = smov [#allocation2]  }
   0x3   :  { %s44_s18 = sshll.u32 %s858_s17, 4  ;;  %s30_s20 = sshll.u32 %s859_s19, 4  ;;  %s45_s18 = int_to_ptr.vmem [resolvable:$true] %s44_s18  ;;  %s926_s20 = int_to_ptr.vmem [resolvable:$true] %s30_s20 }
   0x4   :  { %s764_s23 = scalar_lea.hbm %s1046_s5, 1024 }
   0x5   :  { %p765_p0 = scmp.ne.s32.totalorder %s1046_s5, %s764_s23  ;;  %p768_p1 = scmp.lt.u32.totalorder %s764_s23, %s1046_s5 }
   0x7   :  { %p770_p2 = pnand %p768_p1, %p765_p0 }
   0x9   :  { %773 = shalt.err (!%p770_p2)
}
   0xa   :  { %s774_s28 = scalar_lea.vmem %s45_s18, 1024  ;;  %p779_p4 = scmp.lt.s32.totalorder %s45_s18, %s45_s18 }
   0xb   :  { %p775_p3 = scmp.ne.s32.totalorder %s45_s18, %s774_s28  ;;  %p780_p5 = scmp.lt.s32.totalorder %s774_s28, %s774_s28 }
   0xd   :  { %p781_p6 = por %p780_p5, %p779_p4 }
   0xf   :  { %p782_p7 = pnand %p781_p6, %p775_p3 }
  0x11   :  { %785 = shalt.err (!%p782_p7)
}
  0x12   :  { %s860_s29 = smov 128   ;;  %s861_s30 = smov 8  }
  0x13   :  { %50 = dma.hbm_to_vmem [thread:$0]  %s1046_s5, 1024, %s45_s18, [#allocation5], %s860_s29, %s860_s29, %s861_s30  }
  0x14   :  { %s786_s16 = scalar_lea.hbm %s1044_s3, 1024 }
  0x15   :  { %p787_p8 = scmp.ne.s32.totalorder %s1044_s3, %s786_s16  ;;  %p790_p9 = scmp.lt.u32.totalorder %s786_s16, %s1044_s3 }
  0x17   :  { %p792_p10 = pnand %p790_p9, %p787_p8 }
  0x19   :  { %795 = shalt.err (!%p792_p10)
}
  0x1a   :  { %s796_s23 = scalar_lea.vmem %s926_s20, 1024  ;;  %p801_p12 = scmp.lt.s32.totalorder %s926_s20, %s926_s20 }
  0x1b   :  { %p797_p11 = scmp.ne.s32.totalorder %s926_s20, %s796_s23  ;;  %p802_p13 = scmp.lt.s32.totalorder %s796_s23, %s796_s23 }
  0x1d   :  { %p803_p0 = por %p802_p13, %p801_p12 }
  0x1f   :  { %p804_p1 = pnand %p803_p0, %p797_p11 }
  0x21   :  { %807 = shalt.err (!%p804_p1)
}
  0x22   :  { %36 = dma.hbm_to_vmem [thread:$0]  %s1044_s3, 1024, %s926_s20, [#allocation3], %s860_s29, %s860_s29, %s861_s30  }
  0x23   :  { %s862_s24 = smov [#allocation6]   ;;  %s863_s26 = smov [#allocation7]  }
  0x24   :  { %s58_s25 = sshll.u32 %s862_s24, 4  ;;  %s72_s27 = sshll.u32 %s863_s26, 4  ;;  %s59_s25 = int_to_ptr.vmem [resolvable:$true] %s58_s25  ;;  %s963_s27 = int_to_ptr.vmem [resolvable:$true] %s72_s27 }
  0x25   :  { %s808_s13 = scalar_lea.hbm %s1048_s7, 1024 }
  0x26   :  { %p809_p2 = scmp.ne.s32.totalorder %s1048_s7, %s808_s13  ;;  %p812_p3 = scmp.lt.u32.totalorder %s808_s13, %s1048_s7 }
  0x28   :  { %p814_p4 = pnand %p812_p3, %p809_p2 }
  0x2a   :  { %817 = shalt.err (!%p814_p4)
}
  0x2b   :  { %s818_s3 = scalar_lea.vmem %s59_s25, 1024  ;;  %p823_p6 = scmp.lt.s32.totalorder %s59_s25, %s59_s25 }
  0x2c   :  { %p819_p5 = scmp.ne.s32.totalorder %s59_s25, %s818_s3  ;;  %p824_p7 = scmp.lt.s32.totalorder %s818_s3, %s818_s3 }
  0x2e   :  { %p825_p8 = por %p824_p7, %p823_p6 }
  0x30   :  { %p826_p9 = pnand %p825_p8, %p819_p5 }
  0x32   :  { %829 = shalt.err (!%p826_p9)
}
  0x33   :  { %64 = dma.hbm_to_vmem [thread:$0]  %s1048_s7, 1024, %s59_s25, [#allocation5], %s860_s29, %s860_s29, %s861_s30  }
  0x34   :  { %s830_s23 = scalar_lea.hbm %s1050_s9, 1024 }
  0x35   :  { %p831_p10 = scmp.ne.s32.totalorder %s1050_s9, %s830_s23  ;;  %p834_p11 = scmp.lt.u32.totalorder %s830_s23, %s1050_s9 }
  0x37   :  { %p836_p12 = pnand %p834_p11, %p831_p10 }
  0x39   :  { %839 = shalt.err (!%p836_p12)
}
  0x3a   :  { %s840_s28 = scalar_lea.vmem %s963_s27, 1024  ;;  %p845_p0 = scmp.lt.s32.totalorder %s963_s27, %s963_s27 }
  0x3b   :  { %p841_p13 = scmp.ne.s32.totalorder %s963_s27, %s840_s28  ;;  %p846_p1 = scmp.lt.s32.totalorder %s840_s28, %s840_s28 }
  0x3d   :  { %p847_p2 = por %p846_p1, %p845_p0 }
  0x3f   :  { %p848_p3 = pnand %p847_p2, %p841_p13 }
  0x41   :  { %851 = shalt.err (!%p848_p3)
}
  0x42   :  { %78 = dma.hbm_to_vmem [thread:$0]  %s1050_s9, 1024, %s963_s27, [#allocation8], %s860_s29, %s860_s29, %s861_s30  }
  0x43   :  { %852 = dma.done.wait [#allocation3], 1024  }
  0x44   :  { %853 = vsyncadd [#allocation3], 4294966272 }
  0x45   :  { %854 = dma.done.wait [#allocation5], 2048  }
  0x46   :  { %855 = vsyncadd [#allocation5], 4294965248 }
  0x47   :  { %856 = dma.done.wait [#allocation8], 1024  }
  0x48   :  { %857 = vsyncadd [#allocation8], 4294966272  ;;  %v864_v0 = vmov 0   ;;  %v94_v1 = vld [vmem:[%s1041_s0 + $0x8] sm:$0xff]  ;;  %v93_v2 = vld [vmem:[%s1041_s0] sm:$0xff]  ;;  %v865_v3 = vmov 1  }
  0x49   :  { %746 = vset.pattern.permute.xlu1 %v864_v0  ;;  %744 = vset.pattern.permute.xlu0 %v864_v0  ;;  %v140_v4 = vld [vmem:[#allocation2] sm:$0xff]  ;;  %v141_v5 = vld [vmem:[#allocation2 + $0x8] sm:$0xff]  ;;  %v142_v7 = vld [vmem:[#allocation2 + $0x10] sm:$0xff]  ;;  %vm155_vm0 = vcmask 523264   ;;  %vm531_vm1 = vcmask 23552  }
  0x4a   :  { %103 = vperm.xlu1 %746, %v94_v1   ;;  %98 = vperm.xlu0 %744, %v93_v2   ;;  %v672_v6 = vpack.c.bf16 %v141_v5, %v140_v4  ;;  %v143_v8 = vld [vmem:[#allocation2 + $0x18] sm:$0xff]  ;;  %v144_v10 = vld [vmem:[#allocation2 + $0x20] sm:$0xff]  ;;  %v145_v11 = vld [vmem:[#allocation2 + $0x28] sm:$0xff] }
  0x4b   :  { %v676_v9 = vpack.c.bf16 %v143_v8, %v142_v7  ;;  %v146_v12 = vld [vmem:[#allocation2 + $0x30] sm:$0xff]  ;;  %v680_v13 = vpack.c.bf16 %v145_v11, %v144_v10  ;;  %v147_v14 = vld [vmem:[#allocation2 + $0x38] sm:$0xff]  ;;  %v541_v18 = vld [vmem:[%s1042_s1] ss:$0 sm:$0xff] }
  0x4c   :  { %673 = vmatprep.subr.bf16.mxu0 %v672_v6  ;;  %v684_v15 = vpack.c.bf16 %v147_v14, %v146_v12  ;;  %v542_v19 = vld [vmem:[%s1042_s1 + $0x1] ss:$0 sm:$0xff]  ;;  %v543_v26 = vld [vmem:[%s1043_s2] ss:$0 sm:$0xff]  ;;  %v240_v34 = vld [vmem:[#allocation4 + $0x8] sm:$0xff] }
  0x4d   :  { %675 = vmatpush3.bf16.msra.mxu0 %v672_v6  ;;  %v239_v33 = vld [vmem:[#allocation4] sm:$0xff]  ;;  %v241_v36 = vld [vmem:[#allocation4 + $0x10] sm:$0xff]  ;;  %v242_v37 = vld [vmem:[#allocation4 + $0x18] sm:$0xff] }
  0x4e   :  { %747 = vset.pattern.permute.xlu1 %v865_v3  ;;  %745 = vset.pattern.permute.xlu0 %v865_v3  ;;  %v688_v35 = vpack.c.bf16 %v240_v34, %v239_v33  ;;  %v692_v38 = vpack.c.bf16 %v242_v37, %v241_v36  ;;  %v243_v39 = vld [vmem:[#allocation4 + $0x20] sm:$0xff]  ;;  %v244_v40 = vld [vmem:[#allocation4 + $0x28] sm:$0xff]  ;;  %v245_v41 = vld [vmem:[#allocation4 + $0x30] sm:$0xff] }
  0x4f   :  { %118 = vperm.xlu1 %747, %v94_v1   ;;  %114 = vperm.xlu0 %745, %v93_v2   ;;  %v696_v42 = vpack.c.bf16 %v244_v40, %v243_v39  ;;  %v246_v43 = vld [vmem:[#allocation4 + $0x38] sm:$0xff]  ;;  %v544_v45 = vld [vmem:[%s1045_s4] ss:$0 sm:$0xff]  ;;  %v338_v53 = vld [vmem:[#allocation6 + $0x8] sm:$0xff] }
  0x50   :  { %677 = vmatprep.subr.bf16.mxu0 %v676_v9  ;;  %689 = vmatprep.subr.bf16.mxu1 %v688_v35  ;;  %v700_v44 = vpack.c.bf16 %v246_v43, %v245_v41  ;;  %v337_v52 = vld [vmem:[#allocation6] sm:$0xff]  ;;  %v339_v55 = vld [vmem:[#allocation6 + $0x10] sm:$0xff]  ;;  %v340_v56 = vld [vmem:[#allocation6 + $0x18] sm:$0xff] }
  0x51   :  { %679 = vmatpush3.bf16.msra.mxu0 %v676_v9  ;;  %691 = vmatpush3.bf16.msra.mxu1 %v688_v35  ;;  %v704_v54 = vpack.c.bf16 %v338_v53, %v337_v52  ;;  %v708_v57 = vpack.c.bf16 %v340_v56, %v339_v55  ;;  %v341_v58 = vld [vmem:[#allocation6 + $0x20] sm:$0xff]  ;;  %v342_v59 = vld [vmem:[#allocation6 + $0x28] sm:$0xff]  ;;  %v343_v60 = vld [vmem:[#allocation6 + $0x30] sm:$0xff] }
  0x52   :  { %681 = vmatprep.subr.bf16.mxu0 %v680_v13  ;;  %693 = vmatprep.subr.bf16.mxu1 %v692_v38  ;;  %v712_v61 = vpack.c.bf16 %v342_v59, %v341_v58  ;;  %v344_v62 = vld [vmem:[#allocation6 + $0x38] sm:$0xff]  ;;  %v547_v0 = vld [vmem:[%s1047_s6] ss:$0 sm:$0xff]  ;;  %v436_v8 = vld [vmem:[#allocation7 + $0x8] sm:$0xff] }
  0x53   :  { %v716_v63 = vpack.c.bf16 %v344_v62, %v343_v60  ;;  %v435_v7 = vld [vmem:[#allocation7] sm:$0xff]  ;;  %v437_v10 = vld [vmem:[#allocation7 + $0x10] sm:$0xff]  ;;  %v438_v11 = vld [vmem:[#allocation7 + $0x18] sm:$0xff] }
  0x54   :  { %v720_v9 = vpack.c.bf16 %v436_v8, %v435_v7  ;;  %v724_v12 = vpack.c.bf16 %v438_v11, %v437_v10  ;;  %v440_v14 = vld [vmem:[#allocation7 + $0x28] sm:$0xff] }
  0x55   :  { %683 = vmatpush3.bf16.msra.mxu0 %v680_v13  ;;  %695 = vmatpush3.bf16.msra.mxu1 %v692_v38  ;;  %v439_v13 = vld [vmem:[#allocation7 + $0x20] sm:$0xff] }
  0x56   :  { %685 = vmatprep.subr.bf16.mxu0 %v684_v15  ;;  %697 = vmatprep.subr.bf16.mxu1 %v696_v42 }
  0x59   :  { %687 = vmatpush3.bf16.msra.mxu0 %v684_v15  ;;  %699 = vmatpush3.bf16.msra.mxu1 %v696_v42  ;;  %v441_v15 = vld [vmem:[#allocation7 + $0x30] sm:$0xff] }
  0x5a   :  { %701 = vmatprep.subr.bf16.mxu1 %v700_v44  ;;  %705 = vmatprep.subr.bf16.mxu0 %v704_v54 }
  0x5d   :  { %703 = vmatpush3.bf16.msra.mxu1 %v700_v44 }
  0x5e   :  { %721 = vmatprep.subr.bf16.mxu1 %v720_v9 }
  0xc9   :  { %v99_v16 = vpop.permute.xlu0 %98  ;;  %v104_v17 = vpop.permute.xlu1 %103 }
  0xca   :  { %v110_v22 = vmul.f32 %v541_v18, %v99_v16  ;;  %v111_v23 = vmul.f32 %v541_v18, %v104_v17  ;;  %v728_v16 = vpack.c.bf16 %v440_v14, %v439_v13  ;;  %v442_v17 = vld [vmem:[#allocation7 + $0x38] sm:$0xff] }
  0xcb   :  { %v732_v18 = vpack.c.bf16 %v442_v17, %v441_v15 }
  0xce   :  { %v119_v20 = vpop.permute.xlu1 %118  ;;  %v115_v21 = vpop.permute.xlu0 %114 }
  0xcf   :  { %v126_v24 = vmul.f32 %v542_v19, %v119_v20  ;;  %v125_v25 = vmul.f32 %v542_v19, %v115_v21  ;;  %v550_v19 = vld [vmem:[%s1049_s8] ss:$0 sm:$0xff] }
  0xd1   :  { %v128_v27 = vadd.f32 %v126_v24, %v111_v23  ;;  %v127_v28 = vadd.f32 %v125_v25, %v110_v22 }
  0xd3   :  { %v137_v29 = vadd.f32 %v543_v26, %v128_v27  ;;  %v136_v30 = vadd.f32 %v543_v26, %v127_v28  ;;  %v553_v26 = vld [vmem:[%s1051_s10] ss:$0 sm:$0xff] }
  0xd5   :  { %748 = vtanh.f32 %v137_v29 }
  0xd6   :  { %750 = vtanh.f32 %v136_v30 }
  0xdf   :  { %v749_v31 = vpop.eup %748 }
  0xe0   :  { %v751_v32 = vpop.eup %750 }
  0xe1   :  { %612 = vmatprep.mubr.msk.f32.mxu0 %vm155_vm0, %v751_v32 }
  0xe2   :  { %613 = vmatmul.mubr.msk.f32.vlgmr.msra.gmra.mrb[0].mxu0 %vm155_vm0, %v749_v31 }
  0xe3   :  { %707 = vmatpush3.bf16.msra.mxu0 %v704_v54 }
  0xe4   :  { %709 = vmatprep.subr.bf16.mxu0 %v708_v57 }
  0xe7   :  { %711 = vmatpush3.bf16.msra.mxu0 %v708_v57 }
  0xe8   :  { %713 = vmatprep.subr.bf16.mxu0 %v712_v61 }
  0xeb   :  { %715 = vmatpush3.bf16.msra.mxu0 %v712_v61 }
  0xec   :  { %717 = vmatprep.subr.bf16.mxu0 %v716_v63 }
  0xef   :  { %719 = vmatpush3.bf16.msra.mxu0 %v716_v63 }
 0x1b5   :  { %v614_v46 = vpop.f32.mrb[0].mxu0 }
 0x1b6   :  { %v234_v47 = vadd.f32 %v614_v46, %v544_v45  ;;  %v228_v48 = vpop.f32.mrb[1].mxu0 }
 0x1b7   :  { %v229_v49 = vadd.f32 %v544_v45, %v228_v48 }
 0x1b9   :  { %752 = vtanh.f32 %v229_v49 }
 0x1ba   :  { %754 = vtanh.f32 %v234_v47 }
 0x1c3   :  { %v753_v50 = vpop.eup %752 }
 0x1c4   :  { %v755_v51 = vpop.eup %754  ;;  %631 = vmatprep.mubr.msk.f32.mxu1 %vm155_vm0, %v753_v50 }
 0x1c5   :  { %632 = vmatmul.mubr.msk.f32.vlgmr.msra.gmra.mrb[0].mxu1 %vm155_vm0, %v755_v51 }
 0x1c6   :  { %723 = vmatpush3.bf16.msra.mxu1 %v720_v9 }
 0x1c7   :  { %725 = vmatprep.subr.bf16.mxu1 %v724_v12 }
 0x1ca   :  { %727 = vmatpush3.bf16.msra.mxu1 %v724_v12 }
 0x1cb   :  { %729 = vmatprep.subr.bf16.mxu1 %v728_v16 }
 0x1ce   :  { %731 = vmatpush3.bf16.msra.mxu1 %v728_v16 }
 0x1cf   :  { %733 = vmatprep.subr.bf16.mxu1 %v732_v18 }
 0x1d2   :  { %735 = vmatpush3.bf16.msra.mxu1 %v732_v18 }
 0x298   :  { %v633_v1 = vpop.f32.mrb[0].mxu1 }
 0x299   :  { %v332_v2 = vadd.f32 %v633_v1, %v547_v0  ;;  %v326_v3 = vpop.f32.mrb[1].mxu1 }
 0x29a   :  { %v327_v4 = vadd.f32 %v547_v0, %v326_v3 }
 0x29c   :  { %756 = vtanh.f32 %v327_v4 }
 0x29d   :  { %758 = vtanh.f32 %v332_v2 }
 0x2a6   :  { %v757_v5 = vpop.eup %756 }
 0x2a7   :  { %v759_v6 = vpop.eup %758  ;;  %650 = vmatprep.mubr.msk.f32.mxu0 %vm155_vm0, %v757_v5 }
 0x2a8   :  { %651 = vmatmul.mubr.msk.f32.vlgmr.msra.gmra.mrb[2].mxu0 %vm155_vm0, %v759_v6 }
 0x37b   :  { %v652_v20 = vpop.f32.mrb[2].mxu0 }
 0x37c   :  { %v430_v21 = vadd.f32 %v652_v20, %v550_v19  ;;  %v424_v22 = vpop.f32.mrb[3].mxu0 }
 0x37d   :  { %v425_v23 = vadd.f32 %v550_v19, %v424_v22 }
 0x37f   :  { %760 = vtanh.f32 %v425_v23 }
 0x380   :  { %762 = vtanh.f32 %v430_v21 }
 0x389   :  { %v761_v24 = vpop.eup %760 }
 0x38a   :  { %v763_v25 = vpop.eup %762  ;;  %669 = vmatprep.mubr.msk.f32.mxu1 %vm155_vm0, %v761_v24 }
 0x38b   :  { %670 = vmatmul.mubr.msk.f32.vlgmr.msra.gmra.mrb[2].mxu1 %vm155_vm0, %v763_v25 }
 0x45e   :  { %v671_v27 = vpop.f32.mrb[2].mxu1 }
 0x45f   :  { %v528_v28 = vadd.f32 %v671_v27, %v553_v26  ;;  %v522_v29 = vpop.f32.mrb[3].mxu1 }
 0x460   :  { %v523_v30 = vadd.f32 %v553_v26, %v522_v29 }
 0x461   :  { %533 = vst.msk [vmem:[%s1052_s11 + $0x8] sm:$0xff] %vm531_vm1, %v528_v28 }
 0x462   :  { %532 = vst.msk [vmem:[%s1052_s11] sm:$0xff] %vm531_vm1, %v523_v30 }
 0x463   :  { %538 = vsyncpa [#allocation3], 1 }
 0x464   :  { %539 = vsyncpa [#allocation5], 1 }
 0x465   :  { %540 = vsyncpa [#allocation8], 1 }

</bundles_post_ra>
